<compile_context>
chip_gen: v6e
topology: v6e:2x2x1
jax: 0.10.0
libtpu: 0.0.40
codegen_flags: <defaults>
</compile_context>

<pallas_src>
import jax
import jax.numpy as jnp
from jax.experimental import pallas as pl
from jax.experimental.pallas import tpu as pltpu  # noqa: F401  (kept for TPU-specific tuning)

# ----- synthetic "config" (small shapes) -----
BATCH_SIZE = 2      # config.batchSize
PRIM_NUM = 4        # config.primNum
N_SAMPLES = 32      # config.nSamplesChamfer  (P * S = 128 -> lane-dense, B*P = 8 -> one vreg)


def _round_up(x, m):
    return ((x + m - 1) // m) * m


def _mutex_kernel(params_ref, pts_ref, scale_ref, tsdf_ref):
    """partComposition_mutex for all (batch, eval-primitive) rows at once.

    Blocks (single grid step):
      params_ref (R, 15)      per-row eval-primitive params [dx dy dz tx ty tz r00..r22]
      pts_ref    (3, R, N)    world-space sample points replicated per eval primitive
      scale_ref  (R, N)       set1 (not-own-primitive) mask * eval-primitive IOU
      tsdf_ref   (R, N)       mutex TSDF output
    R = pad8(B*P) sublane rows, N = pad128(P*S) lanes.
    """
    prm = params_ref[...]                                   # (R, 15)
    edx, edy, edz = prm[:, 0:1], prm[:, 1:2], prm[:, 2:3]   # eval half-extents   (R, 1)
    etx, ety, etz = prm[:, 3:4], prm[:, 4:5], prm[:, 5:6]   # eval translation
    r00, r01, r02 = prm[:, 6:7], prm[:, 7:8], prm[:, 8:9]   # eval rotation (row-major)
    r10, r11, r12 = prm[:, 9:10], prm[:, 10:11], prm[:, 11:12]
    r20, r21, r22 = prm[:, 12:13], prm[:, 13:14], prm[:, 14:15]

    px = pts_ref[0]                                         # (R, N)
    py = pts_ref[1]
    pz = pts_ref[2]

    # point in the eval primitive's local frame: R^T (p - t)
    ex, ey, ez = px - etx, py - ety, pz - etz
    bx = r00 * ex + r10 * ey + r20 * ez
    by = r01 * ex + r11 * ey + r21 * ez
    bz = r02 * ex + r12 * ey + r22 * ez

    # clamped inside-distance (>0 only strictly inside the eval primitive)
    pen = jnp.maximum(
        jnp.minimum(jnp.minimum(edx - jnp.abs(bx), edy - jnp.abs(by)),
                    edz - jnp.abs(bz)),
        0.0)

    tsdf_ref[...] = pen * scale_ref[...]                    # scale = not_own * eval IOU


def _quat_to_rot(quat):
    """Normalized quaternion (w, x, y, z) -> row-major rotation matrix, shape (..., 3, 3)."""
    q = quat.astype(jnp.float32)
    q = q * jax.lax.rsqrt(jnp.sum(q * q, axis=-1, keepdims=True) + 1e-12)
    qw, qx, qy, qz = q[..., 0], q[..., 1], q[..., 2], q[..., 3]
    rot = jnp.stack([
        1.0 - 2.0 * (qy * qy + qz * qz), 2.0 * (qx * qy - qw * qz), 2.0 * (qx * qz + qw * qy),
        2.0 * (qx * qy + qw * qz), 1.0 - 2.0 * (qx * qx + qz * qz), 2.0 * (qy * qz - qw * qx),
        2.0 * (qx * qz - qw * qy), 2.0 * (qy * qz + qw * qx), 1.0 - 2.0 * (qx * qx + qy * qy),
    ], axis=-1)
    return rot.reshape(rot.shape[:-1] + (3, 3))


def mutex_loss(shape_rlt, trans_rlt, quat_rlt, iou_list, *, sample_num=N_SAMPLES, key=None):
    """Forward pass of MutexLoss. Returns (tsdfOut, weight, tsdfGT), each (B, P, P*S)."""
    f32 = jnp.float32
    B, P, _ = shape_rlt.shape
    S = sample_num
    N = P * S
    R = B * P
    N_pad = _round_up(N, 128)                               # lane-dense block width
    R_pad = _round_up(R, 8)                                 # full-sublane block height
    if key is None:
        key = jax.random.PRNGKey(0)

    shape_f = shape_rlt.astype(f32)
    trans_f = trans_rlt.astype(f32)
    iou_f = iou_list.reshape(B, P).astype(f32)
    rot = _quat_to_rot(quat_rlt)                            # (B, P, 3, 3)

    # ---- sp.SamplePoint (ifSurface=False): uniform in the cuboid, rotate + translate ----
    u = jax.random.uniform(key, (B, P, S, 3), minval=-1.0, maxval=1.0, dtype=f32)
    local = u * shape_f[:, :, None, :]
    world = jnp.einsum('bpij,bpsj->bpsi', rot, local) + trans_f[:, :, None, :]   # (B,P,S,3)
    pts = world.reshape(B, N, 3)                            # point k belongs to prim k // S

    # replicate points across the eval-primitive axis and fold batch into rows
    pts_rows = jnp.broadcast_to(pts[:, None], (B, P, N, 3)).reshape(R, N, 3)
    pts_rows = jnp.transpose(pts_rows, (2, 0, 1))           # (3, R, N)
    pts_rows = jnp.pad(pts_rows, ((0, 0), (0, R_pad - R), (0, N_pad - N)))

    # eval-primitive params, one sublane row per (batch, eval-prim)
    params = jnp.concatenate(
        [shape_f, trans_f, rot.reshape(B, P, 9)], axis=-1).reshape(R, 15)
    params = jnp.pad(params, ((0, R_pad - R), (0, 0)))

    # set1 mask (zero where the point's source primitive == eval primitive) * eval IOU
    src = jnp.arange(N, dtype=jnp.int32) // S               # (N,)
    own = jnp.arange(P, dtype=jnp.int32)                    # (P,)
    not_own = (src[None, :] != own[:, None]).astype(f32)    # (P, N)
    scale = not_own[None, :, :] * iou_f[:, :, None]         # (B, P, N)
    scale = scale.reshape(R, N)
    scale = jnp.pad(scale, ((0, R_pad - R), (0, N_pad - N)))

    tsdf_pad = pl.pallas_call(
        _mutex_kernel,
        out_shape=jax.ShapeDtypeStruct((R_pad, N_pad), f32),
        grid=(1,),                                          # whole problem in one step
        in_specs=[
            pl.BlockSpec((R_pad, 15), lambda i: (0, 0)),
            pl.BlockSpec((3, R_pad, N_pad), lambda i: (0, 0, 0)),
            pl.BlockSpec((R_pad, N_pad), lambda i: (0, 0)),
        ],
        out_specs=pl.BlockSpec((R_pad, N_pad), lambda i: (0, 0)),
    )(params, pts_rows, scale)

    tsdf_out = tsdf_pad[:R, :N].reshape(B, P, N)

    # ---- sp.SamplePointWeight: weight(point) = IOU(src prim) * dx*dy*dz(src prim) ----
    # TODO(synk): original may use the full volume (8*dx*dy*dz); constant factor only.
    w_prim = iou_f * jnp.prod(shape_f, axis=-1)             # (B, P)
    weight = jnp.repeat(w_prim, S, axis=-1)                 # (B, N)
    weight = jnp.broadcast_to(weight[:, None, :], (B, P, N))

    tsdf_gt = jnp.zeros((B, P, N), f32)                     # mutex ground truth is 0
    return tsdf_out, weight, tsdf_gt


if __name__ == "__main__":
    B, P, S = BATCH_SIZE, PRIM_NUM, N_SAMPLES
    key = jax.random.PRNGKey(0)
    k1, k2, k3, k4, k5 = jax.random.split(key, 5)
    shape_rlt = jax.random.uniform(k1, (B, P, 3), minval=0.2, maxval=0.6, dtype=jnp.float32)
    trans_rlt = jax.random.uniform(k2, (B, P, 3), minval=-0.5, maxval=0.5, dtype=jnp.float32)
    quat_rlt = jax.random.normal(k3, (B, P, 4), dtype=jnp.float32)
    iou_list = jax.random.uniform(k4, (B, P), minval=0.1, maxval=1.0, dtype=jnp.float32)

    fn = jax.jit(lambda a, b, c, d: mutex_loss(a, b, c, d, key=k5))
    tsdf_out, weight, tsdf_gt = fn(shape_rlt, trans_rlt, quat_rlt, iou_list)
    jax.block_until_ready((tsdf_out, weight, tsdf_gt))

    assert tsdf_out.shape == (B, P, P * S)
    assert weight.shape == (B, P, P * S)
    assert tsdf_gt.shape == (B, P, P * S)
    assert bool(jnp.all(jnp.isfinite(tsdf_out)))
    assert bool(jnp.all(jnp.isfinite(weight)))
    assert bool(jnp.all(tsdf_gt == 0.0))
    print("KERNEL_OK")
</pallas_src>

<mosaic_0001>
module attributes {stable_mosaic.version = 11 : i64} {
  func.func @_mutex_kernel(%arg0: i32, %arg1: memref<8x15xf32, #tpu.memory_space<vmem>>, %arg2: memref<3x8x128xf32, #tpu.memory_space<vmem>>, %arg3: memref<8x128xf32, #tpu.memory_space<vmem>>, %arg4: memref<8x128xf32, #tpu.memory_space<vmem>>) attributes {dimension_semantics = [#tpu.dimension_semantics<arbitrary>], iteration_bounds = array<i64: 1>, scalar_prefetch = 0 : i64, scratch_operands = 0 : i64, tpu.core_type = #tpu.core_type<tc>, window_params = [{pipeline_mode = #tpu.pipeline_mode<synchronous>, transform_indices = @transform_0, window_bounds = array<i64: 8, 15>}, {pipeline_mode = #tpu.pipeline_mode<synchronous>, transform_indices = @transform_1, window_bounds = array<i64: 3, 8, 128>}, {pipeline_mode = #tpu.pipeline_mode<synchronous>, transform_indices = @transform_2, window_bounds = array<i64: 8, 128>}, {pipeline_mode = #tpu.pipeline_mode<synchronous>, transform_indices = @transform_3, window_bounds = array<i64: 8, 128>}]} {
    %c0 = arith.constant 0 : index
    %c0_0 = arith.constant 0 : index
    %0 = vector.load %arg1[%c0, %c0_0] : memref<8x15xf32, #tpu.memory_space<vmem>>, vector<8x15xf32>
    %1 = vector.extract_strided_slice %0 {offsets = [0, 0], sizes = [8, 1], strides = [1, 1]} : vector<8x15xf32> to vector<8x1xf32>
    %2 = vector.extract_strided_slice %0 {offsets = [0, 1], sizes = [8, 1], strides = [1, 1]} : vector<8x15xf32> to vector<8x1xf32>
    %3 = vector.extract_strided_slice %0 {offsets = [0, 2], sizes = [8, 1], strides = [1, 1]} : vector<8x15xf32> to vector<8x1xf32>
    %4 = vector.extract_strided_slice %0 {offsets = [0, 3], sizes = [8, 1], strides = [1, 1]} : vector<8x15xf32> to vector<8x1xf32>
    %5 = vector.extract_strided_slice %0 {offsets = [0, 4], sizes = [8, 1], strides = [1, 1]} : vector<8x15xf32> to vector<8x1xf32>
    %6 = vector.extract_strided_slice %0 {offsets = [0, 5], sizes = [8, 1], strides = [1, 1]} : vector<8x15xf32> to vector<8x1xf32>
    %7 = vector.extract_strided_slice %0 {offsets = [0, 6], sizes = [8, 1], strides = [1, 1]} : vector<8x15xf32> to vector<8x1xf32>
    %8 = vector.extract_strided_slice %0 {offsets = [0, 7], sizes = [8, 1], strides = [1, 1]} : vector<8x15xf32> to vector<8x1xf32>
    %9 = vector.extract_strided_slice %0 {offsets = [0, 8], sizes = [8, 1], strides = [1, 1]} : vector<8x15xf32> to vector<8x1xf32>
    %10 = vector.extract_strided_slice %0 {offsets = [0, 9], sizes = [8, 1], strides = [1, 1]} : vector<8x15xf32> to vector<8x1xf32>
    %11 = vector.extract_strided_slice %0 {offsets = [0, 10], sizes = [8, 1], strides = [1, 1]} : vector<8x15xf32> to vector<8x1xf32>
    %12 = vector.extract_strided_slice %0 {offsets = [0, 11], sizes = [8, 1], strides = [1, 1]} : vector<8x15xf32> to vector<8x1xf32>
    %13 = vector.extract_strided_slice %0 {offsets = [0, 12], sizes = [8, 1], strides = [1, 1]} : vector<8x15xf32> to vector<8x1xf32>
    %14 = vector.extract_strided_slice %0 {offsets = [0, 13], sizes = [8, 1], strides = [1, 1]} : vector<8x15xf32> to vector<8x1xf32>
    %15 = vector.extract_strided_slice %0 {offsets = [0, 14], sizes = [8, 1], strides = [1, 1]} : vector<8x15xf32> to vector<8x1xf32>
    %c0_1 = arith.constant 0 : index
    %c0_2 = arith.constant 0 : index
    %c0_3 = arith.constant 0 : index
    %16 = vector.load %arg2[%c0_1, %c0_2, %c0_3] : memref<3x8x128xf32, #tpu.memory_space<vmem>>, vector<1x8x128xf32>
    %17 = vector.shape_cast %16 : vector<1x8x128xf32> to vector<8x128xf32>
    %c1 = arith.constant 1 : index
    %c0_4 = arith.constant 0 : index
    %c0_5 = arith.constant 0 : index
    %18 = vector.load %arg2[%c1, %c0_4, %c0_5] : memref<3x8x128xf32, #tpu.memory_space<vmem>>, vector<1x8x128xf32>
    %19 = vector.shape_cast %18 : vector<1x8x128xf32> to vector<8x128xf32>
    %c2 = arith.constant 2 : index
    %c0_6 = arith.constant 0 : index
    %c0_7 = arith.constant 0 : index
    %20 = vector.load %arg2[%c2, %c0_6, %c0_7] : memref<3x8x128xf32, #tpu.memory_space<vmem>>, vector<1x8x128xf32>
    %21 = vector.shape_cast %20 : vector<1x8x128xf32> to vector<8x128xf32>
    %22 = vector.broadcast %4 : vector<8x1xf32> to vector<8x128xf32>
    %23 = arith.subf %17, %22 : vector<8x128xf32>
    %24 = vector.broadcast %5 : vector<8x1xf32> to vector<8x128xf32>
    %25 = arith.subf %19, %24 : vector<8x128xf32>
    %26 = vector.broadcast %6 : vector<8x1xf32> to vector<8x128xf32>
    %27 = arith.subf %21, %26 : vector<8x128xf32>
    %28 = vector.broadcast %7 : vector<8x1xf32> to vector<8x128xf32>
    %29 = arith.mulf %28, %23 : vector<8x128xf32>
    %30 = vector.broadcast %10 : vector<8x1xf32> to vector<8x128xf32>
    %31 = arith.mulf %30, %25 : vector<8x128xf32>
    %32 = arith.addf %29, %31 : vector<8x128xf32>
    %33 = vector.broadcast %13 : vector<8x1xf32> to vector<8x128xf32>
    %34 = arith.mulf %33, %27 : vector<8x128xf32>
    %35 = arith.addf %32, %34 : vector<8x128xf32>
    %36 = vector.broadcast %8 : vector<8x1xf32> to vector<8x128xf32>
    %37 = arith.mulf %36, %23 : vector<8x128xf32>
    %38 = vector.broadcast %11 : vector<8x1xf32> to vector<8x128xf32>
    %39 = arith.mulf %38, %25 : vector<8x128xf32>
    %40 = arith.addf %37, %39 : vector<8x128xf32>
    %41 = vector.broadcast %14 : vector<8x1xf32> to vector<8x128xf32>
    %42 = arith.mulf %41, %27 : vector<8x128xf32>
    %43 = arith.addf %40, %42 : vector<8x128xf32>
    %44 = vector.broadcast %9 : vector<8x1xf32> to vector<8x128xf32>
    %45 = arith.mulf %44, %23 : vector<8x128xf32>
    %46 = vector.broadcast %12 : vector<8x1xf32> to vector<8x128xf32>
    %47 = arith.mulf %46, %25 : vector<8x128xf32>
    %48 = arith.addf %45, %47 : vector<8x128xf32>
    %49 = vector.broadcast %15 : vector<8x1xf32> to vector<8x128xf32>
    %50 = arith.mulf %49, %27 : vector<8x128xf32>
    %51 = arith.addf %48, %50 : vector<8x128xf32>
    %52 = math.absf %35 : vector<8x128xf32>
    %53 = vector.broadcast %1 : vector<8x1xf32> to vector<8x128xf32>
    %54 = arith.subf %53, %52 : vector<8x128xf32>
    %55 = math.absf %43 : vector<8x128xf32>
    %56 = vector.broadcast %2 : vector<8x1xf32> to vector<8x128xf32>
    %57 = arith.subf %56, %55 : vector<8x128xf32>
    %58 = arith.minimumf %54, %57 : vector<8x128xf32>
    %59 = math.absf %51 : vector<8x128xf32>
    %60 = vector.broadcast %3 : vector<8x1xf32> to vector<8x128xf32>
    %61 = arith.subf %60, %59 : vector<8x128xf32>
    %62 = arith.minimumf %58, %61 : vector<8x128xf32>
    %cst = arith.constant 0.000000e+00 : f32
    %63 = vector.broadcast %cst : f32 to vector<8x128xf32>
    %64 = arith.maximumf %62, %63 : vector<8x128xf32>
    %c0_8 = arith.constant 0 : index
    %c0_9 = arith.constant 0 : index
    %65 = vector.load %arg3[%c0_8, %c0_9] : memref<8x128xf32, #tpu.memory_space<vmem>>, vector<8x128xf32>
    %66 = arith.mulf %64, %65 : vector<8x128xf32>
    %c0_10 = arith.constant 0 : index
    %c0_11 = arith.constant 0 : index
    %67 = vector.load %arg4[%c0_10, %c0_11] : memref<8x128xf32, #tpu.memory_space<vmem>>, vector<8x128xf32>
    tpu.vector_store %arg4[%c0_10, %c0_11], %66 {strides = array<i32>} : memref<8x128xf32, #tpu.memory_space<vmem>>, vector<8x128xf32>,
    return
  }
  func.func @transform_0(%arg0: i32) -> (i32, i32) {
    %c0_i32 = arith.constant 0 : i32
    %c0_i32_0 = arith.constant 0 : i32
    %c0_i32_1 = arith.constant 0 : i32
    return %c0_i32, %c0_i32_0 : i32, i32
  }
  func.func @transform_1(%arg0: i32) -> (i32, i32, i32) {
    %c0_i32 = arith.constant 0 : i32
    %c0_i32_0 = arith.constant 0 : i32
    %c0_i32_1 = arith.constant 0 : i32
    %c0_i32_2 = arith.constant 0 : i32
    return %c0_i32, %c0_i32_0, %c0_i32_1 : i32, i32, i32
  }
  func.func @transform_2(%arg0: i32) -> (i32, i32) {
    %c0_i32 = arith.constant 0 : i32
    %c0_i32_0 = arith.constant 0 : i32
    %c0_i32_1 = arith.constant 0 : i32
    return %c0_i32, %c0_i32_0 : i32, i32
  }
  func.func @transform_3(%arg0: i32) -> (i32, i32) {
    %c0_i32 = arith.constant 0 : i32
    %c0_i32_0 = arith.constant 0 : i32
    %c0_i32_1 = arith.constant 0 : i32
    return %c0_i32, %c0_i32_0 : i32, i32
  }
}

</mosaic_0001>

<bundles_post_ra>
// kernel: mul.95
= control target key start
LH: loop header
LB: loop body
LE: loop exit
PB: predicated region body
PF: predicated region fallthrough
CT: control target
= control target key end

     0   :  { %s34_s0 = inlined_call_operand.vmem [shape: f32[2,4], index: 0, kind: input, shape index: {}]   ;;  %s35_s1 = inlined_call_operand.vmem [shape: f32[2,4], index: 1, kind: input, shape index: {}]   ;;  %s36_s2 = inlined_call_operand.vmem [shape: f32[2,4], index: 2, kind: output, shape index: {}]  }
   0x1   :  { %v3_v0 = vld [vmem:[%s34_s0] sm:$0x3] }
   0x2   :  { %v4_v1 = vld [vmem:[%s35_s1] sm:$0x3] }
   0x3   :  { %v7_v2 = vmul.f32 %v4_v1, %v3_v0 }
   0x5   :  { %9 = vst [vmem:[%s36_s2] sm:$0x3] %v7_v2 }

// kernel: _lambda_.1
= control target key start
LH: loop header
LB: loop body
LE: loop exit
PB: predicated region body
PF: predicated region fallthrough
CT: control target
= control target key end

     0   :  { %v181_v1 = vmov 5   ;;  %v182_v2 = vmov 3   ;;  %s235_s0 = inlined_call_operand.vmem [shape: f32[8,15], index: 0, kind: input, shape index: {}]   ;;  %s236_s1 = inlined_call_operand.vmem [shape: f32[3,8,128], index: 1, kind: input, shape index: {}]   ;;  %s237_s2 = inlined_call_operand.vmem [shape: f32[8,128], index: 2, kind: input, shape index: {}]   ;;  %s238_s3 = inlined_call_operand.hbm [shape: f32[8,128], index: 3, kind: output, shape index: {}]  }
   0x1   :  { %v15_v0 = vld [vmem:[%s235_s0] sm:$0xff]  ;;  %146 = vset.pattern.permute.xlu1 %v181_v1  ;;  %144 = vset.pattern.permute.xlu0 %v182_v2 }
   0x2   :  { %33 = vperm.xlu1 %146, %v15_v0   ;;  %23 = vperm.xlu0 %144, %v15_v0  }
   0x3   :  { %8 = vsyncpa [#allocation3], 0  ;;  %v183_v3 = vmov 6   ;;  %v184_v4 = vmov 4   ;;  %v185_v5 = vmov 9   ;;  %v186_v6 = vmov 7  }
   0x4   :  { %v187_v7 = vmov 10   ;;  %v188_v8 = vmov 13   ;;  %v189_v9 = vmov 12   ;;  %v190_v10 = vmov 14   ;;  %v16_v24 = vld [vmem:[%s236_s1] sm:$0xff]  ;;  %v126_v25 = vld [vmem:[%s236_s1 + $0x8] sm:$0xff] }
   0x5   :  { %v191_v11 = vmov 8   ;;  %v192_v12 = vmov 2   ;;  %v193_v13 = vmov 11   ;;  %v194_v14 = vmov 0   ;;  %v127_v30 = vld [vmem:[%s236_s1 + $0x10] sm:$0xff]  ;;  %v109_v60 = vld [vmem:[%s237_s2] sm:$0xff] }
   0x6   :  { %147 = vset.pattern.permute.xlu1 %v183_v3  ;;  %145 = vset.pattern.permute.xlu0 %v184_v4  ;;  %v195_v15 = vmov 1   ;;  %s196_s20 = smov [#allocation2]  }
   0x7   :  { %38 = vperm.xlu1 %147, %v15_v0   ;;  %28 = vperm.xlu0 %145, %v15_v0   ;;  %s118_s21 = sshll.u32 %s196_s20, 4  ;;  %s119_s21 = int_to_ptr.vmem [resolvable:$true] %s118_s21 }
   0x8   :  { %s159_s22 = scalar_lea.vmem %s119_s21, 128  ;;  %p164_p1 = scmp.lt.s32.totalorder %s119_s21, %s119_s21 }
   0x9   :  { %p160_p0 = scmp.ne.s32.totalorder %s119_s21, %s159_s22  ;;  %p165_p2 = scmp.lt.s32.totalorder %s159_s22, %s159_s22 }
   0xb   :  { %148 = vset.pattern.permute.xlu1 %v185_v5  ;;  %149 = vset.pattern.permute.xlu0 %v186_v6  ;;  %p166_p3 = por %p165_p2, %p164_p1 }
   0xc   :  { %43 = vperm.xlu1 %148, %v15_v0   ;;  %55 = vperm.xlu0 %149, %v15_v0  }
   0xd   :  { %p167_p4 = pnand %p166_p3, %p160_p0 }
  0x10   :  { %150 = vset.pattern.permute.xlu1 %v187_v7  ;;  %152 = vset.pattern.permute.xlu0 %v188_v8 }
  0x11   :  { %60 = vperm.xlu1 %150, %v15_v0   ;;  %66 = vperm.xlu0 %152, %v15_v0  }
  0x15   :  { %151 = vset.pattern.permute.xlu1 %v189_v9  ;;  %155 = vset.pattern.permute.xlu0 %v190_v10 }
  0x16   :  { %49 = vperm.xlu1 %151, %v15_v0   ;;  %83 = vperm.xlu0 %155, %v15_v0  }
  0x1a   :  { %153 = vset.pattern.permute.xlu1 %v191_v11  ;;  %158 = vset.pattern.permute.xlu0 %v192_v12 }
  0x1b   :  { %72 = vperm.xlu1 %153, %v15_v0   ;;  %103 = vperm.xlu0 %158, %v15_v0  }
  0x1f   :  { %154 = vset.pattern.permute.xlu1 %v193_v13 }
  0x20   :  { %77 = vperm.xlu1 %154, %v15_v0  }
  0x24   :  { %156 = vset.pattern.permute.xlu1 %v194_v14 }
  0x25   :  { %90 = vperm.xlu1 %156, %v15_v0  }
  0x29   :  { %157 = vset.pattern.permute.xlu1 %v195_v15 }
  0x2a   :  { %96 = vperm.xlu1 %157, %v15_v0  }
  0x7d   :  { %v34_v16 = vpop.permute.xlu1 %33  ;;  %v24_v18 = vpop.permute.xlu0 %23 }
  0x7e   :  { %v26_v27 = vsub.f32 %v16_v24, %v24_v18  ;;  %v36_v33 = vsub.f32 %v127_v30, %v34_v16 }
  0x82   :  { %v39_v17 = vpop.permute.xlu1 %38  ;;  %v29_v20 = vpop.permute.xlu0 %28 }
  0x83   :  { %v31_v28 = vsub.f32 %v126_v25, %v29_v20  ;;  %v41_v35 = vmul.f32 %v39_v17, %v26_v27 }
  0x87   :  { %v44_v19 = vpop.permute.xlu1 %43  ;;  %v56_v22 = vpop.permute.xlu0 %55 }
  0x88   :  { %v58_v31 = vmul.f32 %v56_v22, %v26_v27  ;;  %v46_v34 = vmul.f32 %v44_v19, %v31_v28 }
  0x8a   :  { %v47_v42 = vadd.f32 %v46_v34, %v41_v35 }
  0x8c   :  { %v61_v21 = vpop.permute.xlu1 %60  ;;  %v67_v26 = vpop.permute.xlu0 %66 }
  0x8d   :  { %v63_v32 = vmul.f32 %v61_v21, %v31_v28  ;;  %v69_v43 = vmul.f32 %v67_v26, %v36_v33 }
  0x8f   :  { %v64_v38 = vadd.f32 %v63_v32, %v58_v31 }
  0x91   :  { %v50_v23 = vpop.permute.xlu1 %49  ;;  %v84_v36 = vpop.permute.xlu0 %83  ;;  %v70_v46 = vadd.f32 %v69_v43, %v64_v38 }
  0x92   :  { %v52_v39 = vmul.f32 %v50_v23, %v36_v33  ;;  %v86_v44 = vmul.f32 %v84_v36, %v36_v33 }
  0x93   :  { %v94_v52 = vand.u32 2147483647, %v70_v46 }
  0x94   :  { %v53_v47 = vadd.f32 %v52_v39, %v47_v42 }
  0x96   :  { %v73_v29 = vpop.permute.xlu1 %72  ;;  %v88_v50 = vand.u32 2147483647, %v53_v47  ;;  %v104_v53 = vpop.permute.xlu0 %103 }
  0x97   :  { %v75_v40 = vmul.f32 %v73_v29, %v26_v27 }
  0x9b   :  { %v78_v37 = vpop.permute.xlu1 %77 }
  0x9c   :  { %v80_v41 = vmul.f32 %v78_v37, %v31_v28 }
  0x9e   :  { %v81_v45 = vadd.f32 %v80_v41, %v75_v40 }
  0xa0   :  { %v91_v48 = vpop.permute.xlu1 %90  ;;  %v87_v49 = vadd.f32 %v86_v44, %v81_v45 }
  0xa1   :  { %v93_v55 = vsub.f32 %v91_v48, %v88_v50 }
  0xa2   :  { %v101_v51 = vand.u32 2147483647, %v87_v49 }
  0xa4   :  { %v106_v57 = vsub.f32 %v104_v53, %v101_v51 }
  0xa5   :  { %v97_v54 = vpop.permute.xlu1 %96 }
  0xa6   :  { %v99_v56 = vsub.f32 %v97_v54, %v94_v52 }
  0xa8   :  { %v100_v58 = vmin.f32 %v93_v55, %v99_v56 }
  0xaa   :  { %v107_v59 = vmin.f32 %v100_v58, %v106_v57 }
  0xac   :  { %v108_v61 = vmax.f32 %v107_v59, 0.0 }
  0xae   :  { %v110_v62 = vmul.f32 %v109_v60, %v108_v61 }
  0xb0   :  { %111 = vst [vmem:[#allocation2] sm:$0xff] %v110_v62 }
  0xb1   :  { %170 = shalt.err (!%p167_p4)
}
  0xb2   :  { %121 = dma.vmem_to_hbm [thread:$0]  %s119_s21, 128, %s238_s3, [#allocation3]  }
  0xb3   :  { %179 = dma.done.wait [#allocation3], 128  }
  0xb4   :  { %180 = vsyncadd [#allocation3], 4294967168 }
  0xb5   :  { %125 = vsyncpa [#allocation3], 1 }

</bundles_post_ra>
